<compile_context>
chip_gen: v5e
topology: v5e:2x2
jax: 0.10.0
libtpu: 0.0.40
codegen_flags: <defaults>
</compile_context>

<pallas_src>
import math
import jax
import jax.numpy as jnp
from jax.experimental import pallas as pl
from jax.experimental.pallas import tpu as pltpu

_LANE = 128     # TPU lane width; output/action dim padded to a multiple of this.
_TILE_B = 256   # batch tile (MXU-native M on v6e/v7x).  Even double-buffered this
                # is a few hundred KB, far under v7x's 32 MiB scoped / 64 MiB VMEM.


def _round_up(n, m):
    return ((n + m - 1) // m) * m


def gaussian_policy_kernel(x_ref, w1_ref, w2_ref, w3_ref, bh_ref, aux_ref, o_ref):
    """One batch tile of clamp(MLP(x), lb, ub), lane-dense padded output."""
    bh = bh_ref[...]             # (2, H): rows = b1, b2
    aux = aux_ref[...]           # (3, A_pad): rows = b3, lb, ub (zero-padded lanes)
    b1, b2 = bh[0:1, :], bh[1:2, :]
    b3, lb, ub = aux[0:1, :], aux[1:2, :], aux[2:3, :]

    # Layer 1: Linear(S -> H) + ReLU
    h1 = jnp.dot(x_ref[...], w1_ref[...], preferred_element_type=jnp.float32)
    h1 = jnp.maximum(h1 + b1, 0.0)
    # Layer 2: Linear(H -> H) + ReLU
    h2 = jnp.dot(h1, w2_ref[...], preferred_element_type=jnp.float32)
    h2 = jnp.maximum(h2 + b2, 0.0)
    # Layer 3: Linear(H -> A_pad) + bias, then clamp to [action_lb, action_ub].
    mean = jnp.dot(h2, w3_ref[...], preferred_element_type=jnp.float32) + b3
    o_ref[...] = jnp.clip(mean, lb, ub).astype(o_ref.dtype)


def pack_params(raw, action_lb, action_ub):
    """One-time packing/padding of GaussianPolicy params for the kernel.

    raw: dict with w1 (S,H), b1 (H,), w2 (H,H), b2 (H,), w3 (H,A), b3 (A,)
         (weights stored as (in, out), i.e. PyTorch nn.Linear weight transposed).
    """
    w1, b1 = raw["w1"], raw["b1"]
    w2, b2 = raw["w2"], raw["b2"]
    w3, b3 = raw["w3"], raw["b3"]
    H = w1.shape[1]
    A = w3.shape[1]
    A_pad = _round_up(A, _LANE)

    w3_p = jnp.zeros((H, A_pad), jnp.float32).at[:, :A].set(w3)
    bias_h = jnp.stack([b1, b2], axis=0).astype(jnp.float32)   # (2, H)
    aux = jnp.zeros((3, A_pad), jnp.float32)
    aux = aux.at[0, :A].set(b3)           # b3
    aux = aux.at[1, :A].set(action_lb)    # lb   (padded lanes: clamp(0,0,0)=0)
    aux = aux.at[2, :A].set(action_ub)    # ub
    return {"w1": w1, "w2": w2, "w3": w3_p, "bias_h": bias_h, "aux": aux,
            "action_dim": A}


def gaussian_policy_forward(x, packed, std_param, min_std, max_std):
    """Pallas-backed GaussianPolicy.forward: returns (mean, std)."""
    B, S = x.shape
    w1, w2, w3 = packed["w1"], packed["w2"], packed["w3"]
    bias_h, aux = packed["bias_h"], packed["aux"]
    H = w1.shape[1]
    A = packed["action_dim"]
    A_pad = w3.shape[1]

    # Batch tiling: a single full-extent block for small batches (no (8,128)
    # constraint when block == array), _TILE_B blocks + zero pad for large ones.
    if B <= _TILE_B:
        tb, B_pad, x_p = B, B, x
    else:
        tb = _TILE_B
        B_pad = _round_up(B, tb)
        x_p = jnp.pad(x, ((0, B_pad - B), (0, 0))) if B_pad != B else x
    grid = (B_pad // tb,)

    nbytes = lambda a: a.size * a.dtype.itemsize
    cost = pl.CostEstimate(
        flops=2 * B_pad * (S * H + H * H + H * A_pad),
        transcendentals=0,
        bytes_accessed=(nbytes(x_p) + nbytes(w1) + nbytes(w2) + nbytes(w3)
                        + nbytes(bias_h) + nbytes(aux) + B_pad * A_pad * 4),
    )

    mean_pad = pl.pallas_call(
        gaussian_policy_kernel,
        out_shape=jax.ShapeDtypeStruct((B_pad, A_pad), jnp.float32),
        grid_spec=pltpu.PrefetchScalarGridSpec(
            num_scalar_prefetch=0,
            grid=grid,
            in_specs=[
                pl.BlockSpec((tb, S), lambda i: (i, 0)),      # x streams over grid
                pl.BlockSpec((S, H), lambda i: (0, 0)),       # weights stay resident
                pl.BlockSpec((H, H), lambda i: (0, 0)),
                pl.BlockSpec((H, A_pad), lambda i: (0, 0)),
                pl.BlockSpec((2, H), lambda i: (0, 0)),       # packed b1/b2
                pl.BlockSpec((3, A_pad), lambda i: (0, 0)),   # packed b3/lb/ub
            ],
            out_specs=pl.BlockSpec((tb, A_pad), lambda i: (i, 0)),
        ),
        compiler_params=pltpu.CompilerParams(
            dimension_semantics=("parallel",)),
        cost_estimate=cost,
    )(x_p, w1, w2, w3, bias_h, aux)

    mean = mean_pad[:B, :A]
    # std head: clamp the (A,) parameter and broadcast.  Zero-FLOP glue kept
    # outside the kernel so we don't pay an extra (B, A_pad) HBM writeback.
    std = jnp.clip(std_param, min_std, max_std)
    return mean, jnp.broadcast_to(std, mean.shape)


def init_raw_params(key, state_dim, hidden_size, action_dim):
    """nn.Linear-style U(-1/sqrt(fan_in), 1/sqrt(fan_in)); W stored as (in, out)."""
    def linear(k, fan_in, fan_out):
        kw, kb = jax.random.split(k)
        bound = 1.0 / math.sqrt(fan_in)
        w = jax.random.uniform(kw, (fan_in, fan_out), jnp.float32, -bound, bound)
        b = jax.random.uniform(kb, (fan_out,), jnp.float32, -bound, bound)
        return w, b

    k1, k2, k3 = jax.random.split(key, 3)
    w1, b1 = linear(k1, state_dim, hidden_size)
    w2, b2 = linear(k2, hidden_size, hidden_size)
    w3, b3 = linear(k3, hidden_size, action_dim)
    return {"w1": w1, "b1": b1, "w2": w2, "b2": b2, "w3": w3, "b3": b3}


def reference_forward(x, raw, action_lb, action_ub, std_param, min_std, max_std):
    hp = jax.lax.Precision.HIGHEST
    h1 = jnp.maximum(jnp.dot(x, raw["w1"], precision=hp) + raw["b1"], 0.0)
    h2 = jnp.maximum(jnp.dot(h1, raw["w2"], precision=hp) + raw["b2"], 0.0)
    mean = jnp.clip(jnp.dot(h2, raw["w3"], precision=hp) + raw["b3"],
                    action_lb, action_ub)
    std = jnp.clip(std_param, min_std, max_std)
    return mean, jnp.broadcast_to(std, mean.shape)


if __name__ == "__main__":
    batch, state_dim, hidden_size, action_dim = 2, 8, 32, 4
    min_std, max_std = 0.05, 1.0

    key = jax.random.PRNGKey(0)
    kx, kp, kx2 = jax.random.split(key, 3)
    x = jax.random.normal(kx, (batch, state_dim), jnp.float32)

    raw = init_raw_params(kp, state_dim, hidden_size, action_dim)
    action_lb = jnp.full((action_dim,), -1.0, jnp.float32)
    action_ub = jnp.full((action_dim,), 1.0, jnp.float32)
    std_param = jnp.full((action_dim,), max_std, jnp.float32)  # matches nn.Parameter init

    # Pack / pad parameters ONCE; rollout steps reuse these device arrays
    # (amortizes weight preparation across calls).
    packed = pack_params(raw, action_lb, action_ub)

    mean, std = gaussian_policy_forward(x, packed, std_param, min_std, max_std)
    mean, std = jax.block_until_ready((mean, std))

    ref_mean, ref_std = reference_forward(x, raw, action_lb, action_ub,
                                          std_param, min_std, max_std)
    assert mean.shape == (batch, action_dim) and std.shape == (batch, action_dim)
    assert jnp.allclose(mean, ref_mean, atol=1e-5, rtol=1e-5)
    assert jnp.allclose(std, ref_std, atol=1e-6, rtol=1e-6)

    # Also exercise the tiled/pipelined path (grid > 1, batch padding).
    xb = jax.random.normal(kx2, (3 * _TILE_B + 37, state_dim), jnp.float32)
    mean_b, _ = gaussian_policy_forward(xb, packed, std_param, min_std, max_std)
    mean_b = jax.block_until_ready(mean_b)
    ref_mean_b, _ = reference_forward(xb, raw, action_lb, action_ub,
                                      std_param, min_std, max_std)
    assert mean_b.shape == (xb.shape[0], action_dim)
    assert jnp.allclose(mean_b, ref_mean_b, atol=1e-5, rtol=1e-5)

    # NOTE: act()/get_logprobs() (Normal sampling + log-prob over (mean, std))
    # are elementwise post-processing outside forward(); not part of the fused path.
    print("KERNEL_OK")
</pallas_src>

<mosaic_0001>
module attributes {stable_mosaic.version = 11 : i64} {
  func.func @gaussian_policy_kernel(%arg0: i32, %arg1: memref<2x8xf32, #tpu.memory_space<vmem>>, %arg2: memref<8x32xf32, #tpu.memory_space<vmem>>, %arg3: memref<32x32xf32, #tpu.memory_space<vmem>>, %arg4: memref<32x128xf32, #tpu.memory_space<vmem>>, %arg5: memref<2x32xf32, #tpu.memory_space<vmem>>, %arg6: memref<3x128xf32, #tpu.memory_space<vmem>>, %arg7: memref<2x128xf32, #tpu.memory_space<vmem>>) attributes {dimension_semantics = [#tpu.dimension_semantics<parallel>], iteration_bounds = array<i64: 1>, scalar_prefetch = 0 : i64, scratch_operands = 0 : i64, tpu.core_type = #tpu.core_type<tc>, window_params = [{transform_indices = @transform_0, window_bounds = array<i64: 2, 8>}, {pipeline_mode = #tpu.pipeline_mode<synchronous>, transform_indices = @transform_1, window_bounds = array<i64: 8, 32>}, {pipeline_mode = #tpu.pipeline_mode<synchronous>, transform_indices = @transform_2, window_bounds = array<i64: 32, 32>}, {pipeline_mode = #tpu.pipeline_mode<synchronous>, transform_indices = @transform_3, window_bounds = array<i64: 32, 128>}, {pipeline_mode = #tpu.pipeline_mode<synchronous>, transform_indices = @transform_4, window_bounds = array<i64: 2, 32>}, {pipeline_mode = #tpu.pipeline_mode<synchronous>, transform_indices = @transform_5, window_bounds = array<i64: 3, 128>}, {transform_indices = @transform_6, window_bounds = array<i64: 2, 128>}]} {
    %c0 = arith.constant 0 : index
    %c0_0 = arith.constant 0 : index
    %0 = vector.load %arg5[%c0, %c0_0] : memref<2x32xf32, #tpu.memory_space<vmem>>, vector<2x32xf32>
    %c0_1 = arith.constant 0 : index
    %c0_2 = arith.constant 0 : index
    %1 = vector.load %arg6[%c0_1, %c0_2] : memref<3x128xf32, #tpu.memory_space<vmem>>, vector<3x128xf32>
    %2 = vector.extract_strided_slice %0 {offsets = [0, 0], sizes = [1, 32], strides = [1, 1]} : vector<2x32xf32> to vector<1x32xf32>
    %3 = vector.extract_strided_slice %0 {offsets = [1, 0], sizes = [1, 32], strides = [1, 1]} : vector<2x32xf32> to vector<1x32xf32>
    %4 = vector.extract_strided_slice %1 {offsets = [0, 0], sizes = [1, 128], strides = [1, 1]} : vector<3x128xf32> to vector<1x128xf32>
    %5 = vector.extract_strided_slice %1 {offsets = [1, 0], sizes = [1, 128], strides = [1, 1]} : vector<3x128xf32> to vector<1x128xf32>
    %6 = vector.extract_strided_slice %1 {offsets = [2, 0], sizes = [1, 128], strides = [1, 1]} : vector<3x128xf32> to vector<1x128xf32>
    %c0_3 = arith.constant 0 : index
    %c0_4 = arith.constant 0 : index
    %7 = vector.load %arg1[%c0_3, %c0_4] : memref<2x8xf32, #tpu.memory_space<vmem>>, vector<2x8xf32>
    %c0_5 = arith.constant 0 : index
    %c0_6 = arith.constant 0 : index
    %8 = vector.load %arg2[%c0_5, %c0_6] : memref<8x32xf32, #tpu.memory_space<vmem>>, vector<8x32xf32>
    %cst = arith.constant dense<0.000000e+00> : vector<2x32xf32>
    %9 = tpu.matmul %7, %8, %cst {dimension_numbers = #tpu.dot_dimension_numbers<[1], [0], [0], [1], [0, 0, 1, 1], [], []>} : vector<2x8xf32>, vector<8x32xf32>, vector<2x32xf32> -> vector<2x32xf32>
    %10 = vector.broadcast %2 : vector<1x32xf32> to vector<2x32xf32>
    %11 = arith.addf %9, %10 : vector<2x32xf32>
    %cst_7 = arith.constant 0.000000e+00 : f32
    %12 = vector.broadcast %cst_7 : f32 to vector<2x32xf32>
    %13 = arith.maximumf %11, %12 : vector<2x32xf32>
    %c0_8 = arith.constant 0 : index
    %c0_9 = arith.constant 0 : index
    %14 = vector.load %arg3[%c0_8, %c0_9] : memref<32x32xf32, #tpu.memory_space<vmem>>, vector<32x32xf32>
    %cst_10 = arith.constant dense<0.000000e+00> : vector<2x32xf32>
    %15 = tpu.matmul %13, %14, %cst_10 {dimension_numbers = #tpu.dot_dimension_numbers<[1], [0], [0], [1], [0, 0, 1, 1], [], []>} : vector<2x32xf32>, vector<32x32xf32>, vector<2x32xf32> -> vector<2x32xf32>
    %16 = vector.broadcast %3 : vector<1x32xf32> to vector<2x32xf32>
    %17 = arith.addf %15, %16 : vector<2x32xf32>
    %cst_11 = arith.constant 0.000000e+00 : f32
    %18 = vector.broadcast %cst_11 : f32 to vector<2x32xf32>
    %19 = arith.maximumf %17, %18 : vector<2x32xf32>
    %c0_12 = arith.constant 0 : index
    %c0_13 = arith.constant 0 : index
    %20 = vector.load %arg4[%c0_12, %c0_13] : memref<32x128xf32, #tpu.memory_space<vmem>>, vector<32x128xf32>
    %cst_14 = arith.constant dense<0.000000e+00> : vector<2x128xf32>
    %21 = tpu.matmul %19, %20, %cst_14 {dimension_numbers = #tpu.dot_dimension_numbers<[1], [0], [0], [1], [0, 0, 1, 1], [], []>} : vector<2x32xf32>, vector<32x128xf32>, vector<2x128xf32> -> vector<2x128xf32>
    %22 = vector.broadcast %4 : vector<1x128xf32> to vector<2x128xf32>
    %23 = arith.addf %21, %22 : vector<2x128xf32>
    %24 = vector.broadcast %5 : vector<1x128xf32> to vector<2x128xf32>
    %25 = arith.maximumf %24, %23 : vector<2x128xf32>
    %26 = vector.broadcast %6 : vector<1x128xf32> to vector<2x128xf32>
    %27 = arith.minimumf %26, %25 : vector<2x128xf32>
    %c0_15 = arith.constant 0 : index
    %c0_16 = arith.constant 0 : index
    %28 = vector.load %arg7[%c0_15, %c0_16] : memref<2x128xf32, #tpu.memory_space<vmem>>, vector<2x128xf32>
    tpu.vector_store %arg7[%c0_15, %c0_16], %27 {strides = array<i32>} : memref<2x128xf32, #tpu.memory_space<vmem>>, vector<2x128xf32>,
    return
  }
  func.func @transform_0(%arg0: i32) -> (i32, i32) {
    %c0_i32 = arith.constant 0 : i32
    %c0_i32_0 = arith.constant 0 : i32
    return %arg0, %c0_i32 : i32, i32
  }
  func.func @transform_1(%arg0: i32) -> (i32, i32) {
    %c0_i32 = arith.constant 0 : i32
    %c0_i32_0 = arith.constant 0 : i32
    %c0_i32_1 = arith.constant 0 : i32
    return %c0_i32, %c0_i32_0 : i32, i32
  }
  func.func @transform_2(%arg0: i32) -> (i32, i32) {
    %c0_i32 = arith.constant 0 : i32
    %c0_i32_0 = arith.constant 0 : i32
    %c0_i32_1 = arith.constant 0 : i32
    return %c0_i32, %c0_i32_0 : i32, i32
  }
  func.func @transform_3(%arg0: i32) -> (i32, i32) {
    %c0_i32 = arith.constant 0 : i32
    %c0_i32_0 = arith.constant 0 : i32
    %c0_i32_1 = arith.constant 0 : i32
    return %c0_i32, %c0_i32_0 : i32, i32
  }
  func.func @transform_4(%arg0: i32) -> (i32, i32) {
    %c0_i32 = arith.constant 0 : i32
    %c0_i32_0 = arith.constant 0 : i32
    %c0_i32_1 = arith.constant 0 : i32
    return %c0_i32, %c0_i32_0 : i32, i32
  }
  func.func @transform_5(%arg0: i32) -> (i32, i32) {
    %c0_i32 = arith.constant 0 : i32
    %c0_i32_0 = arith.constant 0 : i32
    %c0_i32_1 = arith.constant 0 : i32
    return %c0_i32, %c0_i32_0 : i32, i32
  }
  func.func @transform_6(%arg0: i32) -> (i32, i32) {
    %c0_i32 = arith.constant 0 : i32
    %c0_i32_0 = arith.constant 0 : i32
    return %arg0, %c0_i32 : i32, i32
  }
}

</mosaic_0001>

<bundles_post_ra>
// kernel: tpu_custom_call.1
= control target key start
LH: loop header
LB: loop body
LE: loop exit
PB: predicated region body
PF: predicated region fallthrough
CT: control target
= control target key end

     0   :  { %11 = vsyncpa [#allocation3], 0  ;;  %s435_s0 = inlined_call_operand.hbm [shape: f32[2,8], index: 0, kind: input, shape index: {}]   ;;  %s436_s1 = inlined_call_operand.hbm [shape: f32[8,32], index: 1, kind: input, shape index: {}]   ;;  %s437_s2 = inlined_call_operand.hbm [shape: f32[32,32], index: 2, kind: input, shape index: {}]   ;;  %s438_s3 = inlined_call_operand.hbm [shape: f32[32,128], index: 3, kind: input, shape index: {}]   ;;  %s439_s4 = inlined_call_operand.hbm [shape: f32[2,32], index: 4, kind: input, shape index: {}]   ;;  %s440_s5 = inlined_call_operand.vmem [shape: f32[3,128], index: 5, kind: input, shape index: {}]   ;;  %s441_s6 = inlined_call_operand.hbm [shape: f32[2,128], index: 6, kind: output, shape index: {}]  }
   0x1   :  { %12 = vsyncpa [#allocation6], 0 }
   0x2   :  { %13 = vsyncpa [#allocation9], 0  ;;  %s31_s23 = sshll.u32 %s436_s1, 4  ;;  %s32_s23 = int_to_ptr.hbm [resolvable:$true] %s31_s23 }
   0x3   :  { %14 = vsyncpa [#allocation4], 0  ;;  %s371_s24 = smov [#allocation5]   ;;  %s54_s28 = sshll.u32 %s438_s3, 4  ;;  %s55_s28 = int_to_ptr.hbm [resolvable:$true] %s54_s28 }
   0x4   :  { %s33_s25 = sshll.u32 %s371_s24, 4  ;;  %s372_s29 = smov [#allocation8]   ;;  %s34_s25 = int_to_ptr.vmem [resolvable:$true] %s33_s25 }
   0x5   :  { %36 = dma.hbm_to_vmem [thread:$0]  %s32_s23, 128, %s34_s25, [#allocation6]  }
   0x6   :  { %s56_s30 = sshll.u32 %s372_s29, 4  ;;  %s20_s9 = sshll.u32 %s435_s0, 4  ;;  %s57_s30 = int_to_ptr.vmem [resolvable:$true] %s56_s30  ;;  %s21_s9 = int_to_ptr.hbm [resolvable:$true] %s20_s9 }
   0x7   :  { %s373_s1 = smov 128   ;;  %s374_s10 = smov 8  }
   0x8   :  { %62 = dma.hbm_to_vmem [thread:$0]  %s55_s28, 512, %s57_s30, [#allocation9], %s373_s1, %s373_s1, %s374_s10  }
   0x9   :  { %s41_s13 = sshll.u32 %s437_s2, 4  ;;  %s375_s14 = smov [#allocation2]   ;;  %s42_s13 = int_to_ptr.hbm [resolvable:$true] %s41_s13 }
   0xa   :  { %s22_s15 = sshll.u32 %s375_s14, 4  ;;  %s376_s3 = smov [#allocation7]   ;;  %s23_s15 = int_to_ptr.vmem [resolvable:$true] %s22_s15 }
   0xb   :  { %25 = dma.hbm_to_vmem [thread:$0]  %s21_s9, 32, %s23_s15, [#allocation3]  }
   0xc   :  { %s43_s16 = sshll.u32 %s376_s3, 4  ;;  %s68_s0 = sshll.u32 %s439_s4, 4  ;;  %s44_s16 = int_to_ptr.vmem [resolvable:$true] %s43_s16  ;;  %s69_s0 = int_to_ptr.hbm [resolvable:$true] %s68_s0 }
   0xd   :  { %49 = dma.hbm_to_vmem [thread:$0]  %s42_s13, 512, %s44_s16, [#allocation6], %s373_s1, %s373_s1, %s374_s10  }
   0xe   :  { %s377_s19 = smov [#allocation10]  }
   0xf   :  { %s70_s20 = sshll.u32 %s377_s19, 4  ;;  %s71_s20 = int_to_ptr.vmem [resolvable:$true] %s70_s20 }
  0x10   :  { %73 = dma.hbm_to_vmem [thread:$0]  %s69_s0, 32, %s71_s20, [#allocation9]  }
  0x11   :  { %363 = dma.done.wait [#allocation3], 32  }
  0x12   :  { %364 = vsyncadd [#allocation3], 4294967264 }
  0x13   :  { %365 = dma.done.wait [#allocation6], 640  }
  0x14   :  { %366 = vsyncadd [#allocation6], 4294966656 }
  0x15   :  { %367 = dma.done.wait [#allocation9], 544  }
  0x16   :  { %368 = vsyncadd [#allocation9], 4294966752  ;;  %vm101_vm0 = vcmask 64512   ;;  %v99_v0 = vld [vmem:[#allocation5] sm:$0xff]  ;;  %v98_v1 = vld [vmem:[#allocation2] sm:$0x3] }
  0x17   :  { %v129_v2 = vld [vmem:[#allocation7 + $0x18] sm:$0xff]  ;;  %120 = vmatpush.msra.mxu0 %v99_v0  ;;  %v128_v3 = vld [vmem:[#allocation7 + $0x10] sm:$0xff]  ;;  %v127_v4 = vld [vmem:[#allocation7 + $0x8] sm:$0xff]  ;;  %vm131_vm1 = vcmask 261120   ;;  %s378_s21 = smov [#allocation11]   ;;  %s196_s25 = sshll.u32 %s441_s6, 4  ;;  %s197_s25 = int_to_ptr.hbm [resolvable:$true] %s196_s25 }
  0x18   :  { %147 = vmatpush.msra.mxu1 %v129_v2  ;;  %208 = vmatmul.msk.f32.vlgmr.msra.gmra.mxu0 %vm101_vm0, %v98_v1  ;;  %v126_v5 = vld [vmem:[#allocation7] sm:$0xff]  ;;  %v159_v6 = vld [vmem:[#allocation8 + $0x18] sm:$0xff]  ;;  %v158_v12 = vld [vmem:[#allocation8 + $0x10] sm:$0xff]  ;;  %s194_s22 = sshll.u32 %s378_s21, 4  ;;  %s195_s22 = int_to_ptr.vmem [resolvable:$true] %s194_s22 }
  0x19   :  { %176 = vmatpush.msra.mxu2 %v159_v6  ;;  %v96_v7 = vld [vmem:[#allocation10] sm:$0x3]  ;;  %v157_v13 = vld [vmem:[#allocation8 + $0x8] sm:$0xff]  ;;  %v97_v19 = vld [vmem:[%s440_s5] sm:$0x7] }
  0x1a   :  { %148 = vmatpush.msra.mxu1 %v128_v3  ;;  %v100_v8 = vperm.slane %v96_v7, 0  ;;  %v156_v14 = vld [vmem:[#allocation8] sm:$0xff]  ;;  %v130_v15 = vperm.slane %v96_v7, 1  ;;  %v160_v20 = vperm.slane %v97_v19, 0  ;;  %v184_v21 = vperm.slane %v97_v19, 1 }
  0x1b   :  { %177 = vmatpush.msra.mxu2 %v158_v12  ;;  %v186_v24 = vperm.slane %v97_v19, 2 }
  0x1c   :  { %149 = vmatpush.msra.mxu1 %v127_v4 }
  0x1d   :  { %178 = vmatpush.msra.mxu2 %v157_v13 }
  0x1e   :  { %150 = vmatpush.msra.mxu1 %v126_v5 }
  0x1f   :  { %179 = vmatpush.msra.mxu2 %v156_v14 }
  0x95   :  { %v122_v9 = vpop.f32.mrf.mxu0 }
  0x96   :  { %v123_v10 = vadd.f32 %v122_v9, %v100_v8 }
  0x98   :  { %v125_v11 = vmax.f32 %v123_v10, 0.0 }
  0x9a   :  { %209 = vmatmul.msk.f32.vlgmr.msra.gmra.mxu1 %vm131_vm1, %v125_v11 }
 0x117   :  { %v152_v16 = vpop.f32.mrf.mxu1 }
 0x118   :  { %v153_v17 = vadd.f32 %v152_v16, %v130_v15 }
 0x11a   :  { %v155_v18 = vmax.f32 %v153_v17, 0.0 }
 0x11c   :  { %210 = vmatmul.msk.f32.vlgmr.msra.gmra.mxu2 %vm131_vm1, %v155_v18 }
 0x19f   :  { %v181_v22 = vpop.f32.mrf.mxu2 }
 0x1a0   :  { %v182_v23 = vadd.f32 %v181_v22, %v160_v20 }
 0x1a2   :  { %v185_v25 = vmax.f32 %v184_v21, %v182_v23 }
 0x1a4   :  { %v187_v26 = vmin.f32 %v186_v24, %v185_v25 }
 0x1a6   :  { %188 = vst [vmem:[#allocation11] sm:$0x3] %v187_v26 }
 0x1a7   :  { %199 = dma.vmem_to_hbm [thread:$0]  %s195_s22, 32, %s197_s25, [#allocation4]  }
 0x1a8   :  { %369 = dma.done.wait [#allocation4], 32  }
 0x1a9   :  { %370 = vsyncadd [#allocation4], 4294967264 }
 0x1aa   :  { %204 = vsyncpa [#allocation3], 1 }
 0x1ab   :  { %205 = vsyncpa [#allocation6], 1 }
 0x1ac   :  { %206 = vsyncpa [#allocation9], 1 }
 0x1ad   :  { %207 = vsyncpa [#allocation4], 1 }

</bundles_post_ra>
